<compile_context>
chip_gen: v7x
topology: tpu7x:2x2x1
jax: 0.10.0
libtpu: 0.0.40
codegen_flags: <defaults>
</compile_context>

<pallas_src>
import functools
import math

import numpy as np
import jax
import jax.numpy as jnp
from jax.experimental import pallas as pl
from jax.experimental.pallas import tpu as pltpu


def _critic_decoder_kernel(x_ref, w1_ref, b1_ref, w2_ref, b2_ref, out_ref,
                           *, H, dot_dtype):
    """One batch chunk per grid step, lane-folded layout.

    x_ref:  (Bt*H, W*Cin)        input rows, channels folded into lanes
    w1_ref: (3, W*Cin, W*Hid)    banded conv1 weights (one band per kernel row)
    b1_ref: (1, W*Hid)           conv1 bias, tiled across W
    w2_ref: (3, W*Hid, W*Cout)   banded conv2 weights
    b2_ref: (1, W*Cout)          conv2 bias, tiled across W
    out_ref:(Bt*H, W*Cout)       decoder logits (row = (b, h), lane = (w, c))
    """
    M = x_ref.shape[0]
    row = jax.lax.broadcasted_iota(jnp.int32, (M, 1), 0)
    rh = row % H  # row index within one batch element

    def banded_conv(inp_f32, w_ref):
        # sum over the 3 kernel rows; each is one full-width MXU matmul.
        acc = None
        for dh in range(3):
            s = dh - 1  # input-row shift
            if s == 0:
                shifted = inp_f32
            else:
                # y[r] = inp[r + s]; rows whose shift crosses a batch-element
                # boundary (top/bottom "same" padding) are zeroed.
                shifted = jnp.roll(inp_f32, -s, axis=0)
                valid = (rh + s >= 0) & (rh + s < H)
                shifted = jnp.where(valid, shifted, 0.0)
            term = jnp.dot(shifted.astype(dot_dtype), w_ref[dh],
                           preferred_element_type=jnp.float32)
            acc = term if acc is None else acc + term
        return acc

    x = x_ref[...]                                            # f32
    h1 = jnp.maximum(banded_conv(x, w1_ref) + b1_ref[...], 0.0)   # f32 bias/ReLU
    out = banded_conv(h1, w2_ref) + b2_ref[...]
    out_ref[...] = out.astype(out_ref.dtype)


def _build_banded(w, W):
    """Build banded weight matrices from HWIO conv weights.

    w: (3, 3, Ci, Co)  ->  (3, W*Ci, W*Co) with
    band[dh, w_in*Ci + ci, w_out*Co + co] = w[dh, w_in - w_out + 1, ci, co]
    (zero outside the 3-wide band => 'SAME' zero padding along W for free).
    """
    kh, kw, Ci, Co = w.shape
    w_in = jnp.arange(W)[:, None]
    w_out = jnp.arange(W)[None, :]
    dw = w_in - w_out + (kw // 2)                       # (W, W)
    valid = (dw >= 0) & (dw < kw)
    dw_c = jnp.clip(dw, 0, kw - 1)
    band = w[:, dw_c]                                   # (kh, W_in, W_out, Ci, Co)
    band = band * valid[None, :, :, None, None].astype(w.dtype)
    band = band.transpose(0, 1, 3, 2, 4).reshape(kh, W * Ci, W * Co)
    return band


def decoder_pallas(h_nhwc, w1, b1, w2, b2, *, dot_dtype=jnp.bfloat16,
                   batch_tile=None):
    """2-layer conv decoder; h_nhwc: (B, H, W, Cin) -> (B, H, W, Cout)."""
    B, H, W, Cin = h_nhwc.shape
    Hid = w1.shape[-1]
    Cout = w2.shape[-1]

    if batch_tile is None:
        # whole batch per step for small B; chunk for large B.
        # (On v7x one could instead keep >=2 grid steps so both TensorCores
        #  stay busy -- at these sizes it makes no measurable difference.)
        batch_tile = B if B <= 8 else max(1, math.gcd(B, 8))
    Bt = batch_tile
    assert B % Bt == 0, "batch_tile must divide B"

    # lane-folded activations: row = (b, h), lane = (w, c)
    x2d = h_nhwc.reshape(B * H, W * Cin).astype(jnp.float32)

    wb1 = _build_banded(w1, W).astype(dot_dtype)        # (3, W*Cin, W*Hid)
    wb2 = _build_banded(w2, W).astype(dot_dtype)        # (3, W*Hid, W*Cout)
    b1t = jnp.tile(b1.reshape(1, Hid), (1, W)).astype(jnp.float32)   # (1, W*Hid)
    b2t = jnp.tile(b2.reshape(1, Cout), (1, W)).astype(jnp.float32)  # (1, W*Cout)

    kernel = functools.partial(_critic_decoder_kernel, H=H, dot_dtype=dot_dtype)

    out2d = pl.pallas_call(
        kernel,
        out_shape=jax.ShapeDtypeStruct((B * H, W * Cout), jnp.float32),
        grid_spec=pltpu.PrefetchScalarGridSpec(
            num_scalar_prefetch=0,
            grid=(B // Bt,),
            in_specs=[
                pl.BlockSpec((Bt * H, W * Cin), lambda b: (b, 0)),
                pl.BlockSpec((3, W * Cin, W * Hid), lambda b: (0, 0, 0)),
                pl.BlockSpec((1, W * Hid), lambda b: (0, 0)),
                pl.BlockSpec((3, W * Hid, W * Cout), lambda b: (0, 0, 0)),
                pl.BlockSpec((1, W * Cout), lambda b: (0, 0)),
            ],
            out_specs=pl.BlockSpec((Bt * H, W * Cout), lambda b: (b, 0)),
        ),
        compiler_params=pltpu.CompilerParams(
            dimension_semantics=("parallel",)),
    )(x2d, wb1, b1t, wb2, b2t)

    return out2d.reshape(B, H, W, Cout)


class CriticPallas:
    """Mirrors Critic.__init__ / forward / pad_rearrange semantics."""

    def __init__(self, input_shape, output_channels, in_channels, hidden, key):
        self.in_shape = input_shape
        max_dim = int(np.max(np.array(self.in_shape[:2])))
        self.padding = np.zeros((3, 2), dtype=int)
        pad = (max_dim - np.array(self.in_shape[:2])) / 2
        self.padding[:2] = pad.reshape(2, 1)

        # deterministic Xavier/Glorot-uniform init (utils.init_xavier_weights)
        k1, k2 = jax.random.split(key, 2)

        def xavier(k, shape):
            fan_in = shape[0] * shape[1] * shape[2]
            fan_out = shape[0] * shape[1] * shape[3]
            limit = float(np.sqrt(6.0 / (fan_in + fan_out)))
            return jax.random.uniform(k, shape, jnp.float32, -limit, limit)

        self.w1 = xavier(k1, (3, 3, in_channels, hidden))
        self.b1 = jnp.zeros((1, hidden), jnp.float32)
        self.w2 = xavier(k2, (3, 3, hidden, output_channels))
        self.b2 = jnp.zeros((1, output_channels), jnp.float32)

    def forward(self, h_nhwc):
        logits_critic = decoder_pallas(h_nhwc, self.w1, self.b1,
                                       self.w2, self.b2)
        return self.pad_rearrange(logits_critic)

    def pad_rearrange(self, logits):
        c0 = self.padding[:2, 0]
        c1 = c0 + np.array(self.in_shape[:2])
        logits = logits[:, c0[0]:c1[0], c0[1]:c1[1], :]
        B = logits.shape[0]
        # Rearrange('b h w c -> b (h w c)')
        return logits.reshape(B, -1)


def _reference_forward(critic, h_nhwc, dot_dtype=jnp.bfloat16):
    """Pure-JAX reference (lax conv). Operands are rounded to the kernel's
    matmul dtype so the comparison is numerically tight."""
    f32 = jnp.float32
    dn = ('NHWC', 'HWIO', 'NHWC')
    x = h_nhwc.astype(dot_dtype).astype(f32)
    w1 = critic.w1.astype(dot_dtype).astype(f32)
    w2 = critic.w2.astype(dot_dtype).astype(f32)
    y = jax.lax.conv_general_dilated(x, w1, (1, 1), 'SAME',
                                     dimension_numbers=dn) + critic.b1[0]
    y = jnp.maximum(y, 0.0)
    y = y.astype(dot_dtype).astype(f32)
    y = jax.lax.conv_general_dilated(y, w2, (1, 1), 'SAME',
                                     dimension_numbers=dn) + critic.b2[0]
    return critic.pad_rearrange(y)


if __name__ == "__main__":
    key = jax.random.PRNGKey(0)
    k_param, k_in = jax.random.split(key)

    # small, module-consistent shapes
    input_shape = (16, 12, 8)   # (H, W, C) of the environment observation
    output_channels = 2
    in_channels = 8             # channels of the latent h fed to the critic
    hidden = 16
    batch = 2
    max_dim = int(np.max(np.array(input_shape[:2])))  # 16

    critic = CriticPallas(input_shape, output_channels, in_channels, hidden,
                          k_param)

    # latent h: (B, max_dim, max_dim, Cin) in NHWC
    h = jax.random.normal(k_in, (batch, max_dim, max_dim, in_channels),
                          jnp.float32)

    out = jax.block_until_ready(critic.forward(h))

    # expected flattened size: H * W * output_channels
    assert out.shape == (batch, input_shape[0] * input_shape[1] * output_channels)

    ref = jax.block_until_ready(_reference_forward(critic, h))
    np.testing.assert_allclose(np.asarray(out), np.asarray(ref),
                               rtol=1e-2, atol=1e-2)

    print("KERNEL_OK")
</pallas_src>

<mosaic_0001>
module attributes {stable_mosaic.version = 11 : i64} {
  func.func @_critic_decoder_kernel(%arg0: i32, %arg1: memref<32x128xf32, #tpu.memory_space<vmem>>, %arg2: memref<3x128x256xbf16, #tpu.memory_space<vmem>>, %arg3: memref<1x256xf32, #tpu.memory_space<vmem>>, %arg4: memref<3x256x32xbf16, #tpu.memory_space<vmem>>, %arg5: memref<1x32xf32, #tpu.memory_space<vmem>>, %arg6: memref<32x32xf32, #tpu.memory_space<vmem>>) attributes {dimension_semantics = [#tpu.dimension_semantics<parallel>], iteration_bounds = array<i64: 1>, scalar_prefetch = 0 : i64, scratch_operands = 0 : i64, tpu.core_type = #tpu.core_type<tc>, window_params = [{transform_indices = @transform_0, window_bounds = array<i64: 32, 128>}, {pipeline_mode = #tpu.pipeline_mode<synchronous>, transform_indices = @transform_1, window_bounds = array<i64: 3, 128, 256>}, {pipeline_mode = #tpu.pipeline_mode<synchronous>, transform_indices = @transform_2, window_bounds = array<i64: 1, 256>}, {pipeline_mode = #tpu.pipeline_mode<synchronous>, transform_indices = @transform_3, window_bounds = array<i64: 3, 256, 32>}, {pipeline_mode = #tpu.pipeline_mode<synchronous>, transform_indices = @transform_4, window_bounds = array<i64: 1, 32>}, {transform_indices = @transform_5, window_bounds = array<i64: 32, 32>}]} {
    %0 = tpu.iota {dimensions = array<i32: 0>} : vector<32x1xi32>
    %c16_i32 = arith.constant 16 : i32
    %c0_i32 = arith.constant 0 : i32
    %1 = arith.cmpi eq, %c16_i32, %c0_i32 : i32
    %c1_i32 = arith.constant 1 : i32
    %2 = arith.select %1, %c1_i32, %c16_i32 : i32
    %3 = vector.broadcast %2 : i32 to vector<32x1xi32>
    %4 = arith.remsi %0, %3 : vector<32x1xi32>
    %c0_i32_0 = arith.constant 0 : i32
    %5 = vector.broadcast %c0_i32_0 : i32 to vector<32x1xi32>
    %6 = arith.cmpi ne, %4, %5 : vector<32x1xi32>
    %c0_i32_1 = arith.constant 0 : i32
    %7 = vector.broadcast %c0_i32_1 : i32 to vector<32x1xi32>
    %8 = arith.cmpi slt, %4, %7 : vector<32x1xi32>
    %c0_i32_2 = arith.constant 0 : i32
    %9 = arith.cmpi slt, %2, %c0_i32_2 : i32
    %10 = vector.broadcast %9 : i1 to vector<32x1xi1>
    %11 = vector.broadcast %10 : vector<32x1xi1> to vector<32x1xi1>
    %12 = arith.xori %8, %11 : vector<32x1xi1>
    %13 = arith.andi %12, %6 : vector<32x1xi1>
    %14 = vector.broadcast %2 : i32 to vector<32x1xi32>
    %15 = arith.addi %4, %14 : vector<32x1xi32>
    %16 = arith.select %13, %15, %4 : vector<32x1xi1>, vector<32x1xi32>
    %c0 = arith.constant 0 : index
    %c0_3 = arith.constant 0 : index
    %17 = vector.load %arg1[%c0, %c0_3] : memref<32x128xf32, #tpu.memory_space<vmem>>, vector<32x128xf32>
    %18 = vector.extract_strided_slice %17 {offsets = [31, 0], sizes = [1, 128], strides = [1, 1]} : vector<32x128xf32> to vector<1x128xf32>
    %19 = vector.extract_strided_slice %17 {offsets = [0, 0], sizes = [31, 128], strides = [1, 1]} : vector<32x128xf32> to vector<31x128xf32>
    %20 = tpu.concatenate %18, %19 in 0 : vector<1x128xf32>, vector<31x128xf32> -> vector<32x128xf32>
    %c-1_i32 = arith.constant -1 : i32
    %21 = vector.broadcast %c-1_i32 : i32 to vector<32x1xi32>
    %22 = arith.addi %16, %21 : vector<32x1xi32>
    %c0_i32_4 = arith.constant 0 : i32
    %23 = vector.broadcast %c0_i32_4 : i32 to vector<32x1xi32>
    %24 = arith.cmpi sge, %22, %23 : vector<32x1xi32>
    %c-1_i32_5 = arith.constant -1 : i32
    %25 = vector.broadcast %c-1_i32_5 : i32 to vector<32x1xi32>
    %26 = arith.addi %16, %25 : vector<32x1xi32>
    %c16_i32_6 = arith.constant 16 : i32
    %27 = vector.broadcast %c16_i32_6 : i32 to vector<32x1xi32>
    %28 = arith.cmpi slt, %26, %27 : vector<32x1xi32>
    %29 = arith.andi %24, %28 : vector<32x1xi1>
    %cst = arith.constant 0.000000e+00 : f32
    %30 = vector.shape_cast %29 : vector<32x1xi1> to vector<32x1xi1>
    %31 = vector.broadcast %30 : vector<32x1xi1> to vector<32x128xi1>
    %32 = vector.broadcast %cst : f32 to vector<32x128xf32>
    %33 = arith.select %31, %20, %32 : vector<32x128xi1>, vector<32x128xf32>
    %34 = arith.truncf %33 : vector<32x128xf32> to vector<32x128xbf16>
    %c0_7 = arith.constant 0 : index
    %c0_8 = arith.constant 0 : index
    %c0_9 = arith.constant 0 : index
    %35 = vector.load %arg2[%c0_7, %c0_8, %c0_9] : memref<3x128x256xbf16, #tpu.memory_space<vmem>>, vector<1x128x256xbf16>
    %36 = vector.shape_cast %35 : vector<1x128x256xbf16> to vector<128x256xbf16>
    %cst_10 = arith.constant dense<0.000000e+00> : vector<32x256xf32>
    %37 = tpu.matmul %34, %36, %cst_10 {dimension_numbers = #tpu.dot_dimension_numbers<[1], [0], [0], [1], [0, 0, 1, 1], [], []>} : vector<32x128xbf16>, vector<128x256xbf16>, vector<32x256xf32> -> vector<32x256xf32>
    %38 = arith.truncf %17 : vector<32x128xf32> to vector<32x128xbf16>
    %c1 = arith.constant 1 : index
    %c0_11 = arith.constant 0 : index
    %c0_12 = arith.constant 0 : index
    %39 = vector.load %arg2[%c1, %c0_11, %c0_12] : memref<3x128x256xbf16, #tpu.memory_space<vmem>>, vector<1x128x256xbf16>
    %40 = vector.shape_cast %39 : vector<1x128x256xbf16> to vector<128x256xbf16>
    %cst_13 = arith.constant dense<0.000000e+00> : vector<32x256xf32>
    %41 = tpu.matmul %38, %40, %cst_13 {dimension_numbers = #tpu.dot_dimension_numbers<[1], [0], [0], [1], [0, 0, 1, 1], [], []>} : vector<32x128xbf16>, vector<128x256xbf16>, vector<32x256xf32> -> vector<32x256xf32>
    %42 = arith.addf %37, %41 : vector<32x256xf32>
    %43 = vector.extract_strided_slice %17 {offsets = [1, 0], sizes = [31, 128], strides = [1, 1]} : vector<32x128xf32> to vector<31x128xf32>
    %44 = vector.extract_strided_slice %17 {offsets = [0, 0], sizes = [1, 128], strides = [1, 1]} : vector<32x128xf32> to vector<1x128xf32>
    %45 = tpu.concatenate %43, %44 in 0 : vector<31x128xf32>, vector<1x128xf32> -> vector<32x128xf32>
    %c1_i32_14 = arith.constant 1 : i32
    %46 = vector.broadcast %c1_i32_14 : i32 to vector<32x1xi32>
    %47 = arith.addi %16, %46 : vector<32x1xi32>
    %c0_i32_15 = arith.constant 0 : i32
    %48 = vector.broadcast %c0_i32_15 : i32 to vector<32x1xi32>
    %49 = arith.cmpi sge, %47, %48 : vector<32x1xi32>
    %c1_i32_16 = arith.constant 1 : i32
    %50 = vector.broadcast %c1_i32_16 : i32 to vector<32x1xi32>
    %51 = arith.addi %16, %50 : vector<32x1xi32>
    %c16_i32_17 = arith.constant 16 : i32
    %52 = vector.broadcast %c16_i32_17 : i32 to vector<32x1xi32>
    %53 = arith.cmpi slt, %51, %52 : vector<32x1xi32>
    %54 = arith.andi %49, %53 : vector<32x1xi1>
    %cst_18 = arith.constant 0.000000e+00 : f32
    %55 = vector.shape_cast %54 : vector<32x1xi1> to vector<32x1xi1>
    %56 = vector.broadcast %55 : vector<32x1xi1> to vector<32x128xi1>
    %57 = vector.broadcast %cst_18 : f32 to vector<32x128xf32>
    %58 = arith.select %56, %45, %57 : vector<32x128xi1>, vector<32x128xf32>
    %59 = arith.truncf %58 : vector<32x128xf32> to vector<32x128xbf16>
    %c2 = arith.constant 2 : index
    %c0_19 = arith.constant 0 : index
    %c0_20 = arith.constant 0 : index
    %60 = vector.load %arg2[%c2, %c0_19, %c0_20] : memref<3x128x256xbf16, #tpu.memory_space<vmem>>, vector<1x128x256xbf16>
    %61 = vector.shape_cast %60 : vector<1x128x256xbf16> to vector<128x256xbf16>
    %cst_21 = arith.constant dense<0.000000e+00> : vector<32x256xf32>
    %62 = tpu.matmul %59, %61, %cst_21 {dimension_numbers = #tpu.dot_dimension_numbers<[1], [0], [0], [1], [0, 0, 1, 1], [], []>} : vector<32x128xbf16>, vector<128x256xbf16>, vector<32x256xf32> -> vector<32x256xf32>
    %63 = arith.addf %42, %62 : vector<32x256xf32>
    %c0_22 = arith.constant 0 : index
    %c0_23 = arith.constant 0 : index
    %64 = vector.load %arg3[%c0_22, %c0_23] : memref<1x256xf32, #tpu.memory_space<vmem>>, vector<1x256xf32>
    %65 = vector.broadcast %64 : vector<1x256xf32> to vector<32x256xf32>
    %66 = arith.addf %63, %65 : vector<32x256xf32>
    %cst_24 = arith.constant 0.000000e+00 : f32
    %67 = vector.broadcast %cst_24 : f32 to vector<32x256xf32>
    %68 = arith.maximumf %66, %67 : vector<32x256xf32>
    %69 = vector.extract_strided_slice %68 {offsets = [31, 0], sizes = [1, 256], strides = [1, 1]} : vector<32x256xf32> to vector<1x256xf32>
    %70 = vector.extract_strided_slice %68 {offsets = [0, 0], sizes = [31, 256], strides = [1, 1]} : vector<32x256xf32> to vector<31x256xf32>
    %71 = tpu.concatenate %69, %70 in 0 : vector<1x256xf32>, vector<31x256xf32> -> vector<32x256xf32>
    %c-1_i32_25 = arith.constant -1 : i32
    %72 = vector.broadcast %c-1_i32_25 : i32 to vector<32x1xi32>
    %73 = arith.addi %16, %72 : vector<32x1xi32>
    %c0_i32_26 = arith.constant 0 : i32
    %74 = vector.broadcast %c0_i32_26 : i32 to vector<32x1xi32>
    %75 = arith.cmpi sge, %73, %74 : vector<32x1xi32>
    %c-1_i32_27 = arith.constant -1 : i32
    %76 = vector.broadcast %c-1_i32_27 : i32 to vector<32x1xi32>
    %77 = arith.addi %16, %76 : vector<32x1xi32>
    %c16_i32_28 = arith.constant 16 : i32
    %78 = vector.broadcast %c16_i32_28 : i32 to vector<32x1xi32>
    %79 = arith.cmpi slt, %77, %78 : vector<32x1xi32>
    %80 = arith.andi %75, %79 : vector<32x1xi1>
    %cst_29 = arith.constant 0.000000e+00 : f32
    %81 = vector.shape_cast %80 : vector<32x1xi1> to vector<32x1xi1>
    %82 = vector.broadcast %81 : vector<32x1xi1> to vector<32x256xi1>
    %83 = vector.broadcast %cst_29 : f32 to vector<32x256xf32>
    %84 = arith.select %82, %71, %83 : vector<32x256xi1>, vector<32x256xf32>
    %85 = arith.truncf %84 : vector<32x256xf32> to vector<32x256xbf16>
    %c0_30 = arith.constant 0 : index
    %c0_31 = arith.constant 0 : index
    %c0_32 = arith.constant 0 : index
    %86 = vector.load %arg4[%c0_30, %c0_31, %c0_32] : memref<3x256x32xbf16, #tpu.memory_space<vmem>>, vector<1x256x32xbf16>
    %87 = vector.shape_cast %86 : vector<1x256x32xbf16> to vector<256x32xbf16>
    %cst_33 = arith.constant dense<0.000000e+00> : vector<32x32xf32>
    %88 = tpu.matmul %85, %87, %cst_33 {dimension_numbers = #tpu.dot_dimension_numbers<[1], [0], [0], [1], [0, 0, 1, 1], [], []>} : vector<32x256xbf16>, vector<256x32xbf16>, vector<32x32xf32> -> vector<32x32xf32>
    %89 = arith.truncf %68 : vector<32x256xf32> to vector<32x256xbf16>
    %c1_34 = arith.constant 1 : index
    %c0_35 = arith.constant 0 : index
    %c0_36 = arith.constant 0 : index
    %90 = vector.load %arg4[%c1_34, %c0_35, %c0_36] : memref<3x256x32xbf16, #tpu.memory_space<vmem>>, vector<1x256x32xbf16>
    %91 = vector.shape_cast %90 : vector<1x256x32xbf16> to vector<256x32xbf16>
    %cst_37 = arith.constant dense<0.000000e+00> : vector<32x32xf32>
    %92 = tpu.matmul %89, %91, %cst_37 {dimension_numbers = #tpu.dot_dimension_numbers<[1], [0], [0], [1], [0, 0, 1, 1], [], []>} : vector<32x256xbf16>, vector<256x32xbf16>, vector<32x32xf32> -> vector<32x32xf32>
    %93 = arith.addf %88, %92 : vector<32x32xf32>
    %94 = vector.extract_strided_slice %68 {offsets = [1, 0], sizes = [31, 256], strides = [1, 1]} : vector<32x256xf32> to vector<31x256xf32>
    %95 = vector.extract_strided_slice %68 {offsets = [0, 0], sizes = [1, 256], strides = [1, 1]} : vector<32x256xf32> to vector<1x256xf32>
    %96 = tpu.concatenate %94, %95 in 0 : vector<31x256xf32>, vector<1x256xf32> -> vector<32x256xf32>
    %c1_i32_38 = arith.constant 1 : i32
    %97 = vector.broadcast %c1_i32_38 : i32 to vector<32x1xi32>
    %98 = arith.addi %16, %97 : vector<32x1xi32>
    %c0_i32_39 = arith.constant 0 : i32
    %99 = vector.broadcast %c0_i32_39 : i32 to vector<32x1xi32>
    %100 = arith.cmpi sge, %98, %99 : vector<32x1xi32>
    %c1_i32_40 = arith.constant 1 : i32
    %101 = vector.broadcast %c1_i32_40 : i32 to vector<32x1xi32>
    %102 = arith.addi %16, %101 : vector<32x1xi32>
    %c16_i32_41 = arith.constant 16 : i32
    %103 = vector.broadcast %c16_i32_41 : i32 to vector<32x1xi32>
    %104 = arith.cmpi slt, %102, %103 : vector<32x1xi32>
    %105 = arith.andi %100, %104 : vector<32x1xi1>
    %cst_42 = arith.constant 0.000000e+00 : f32
    %106 = vector.shape_cast %105 : vector<32x1xi1> to vector<32x1xi1>
    %107 = vector.broadcast %106 : vector<32x1xi1> to vector<32x256xi1>
    %108 = vector.broadcast %cst_42 : f32 to vector<32x256xf32>
    %109 = arith.select %107, %96, %108 : vector<32x256xi1>, vector<32x256xf32>
    %110 = arith.truncf %109 : vector<32x256xf32> to vector<32x256xbf16>
    %c2_43 = arith.constant 2 : index
    %c0_44 = arith.constant 0 : index
    %c0_45 = arith.constant 0 : index
    %111 = vector.load %arg4[%c2_43, %c0_44, %c0_45] : memref<3x256x32xbf16, #tpu.memory_space<vmem>>, vector<1x256x32xbf16>
    %112 = vector.shape_cast %111 : vector<1x256x32xbf16> to vector<256x32xbf16>
    %cst_46 = arith.constant dense<0.000000e+00> : vector<32x32xf32>
    %113 = tpu.matmul %110, %112, %cst_46 {dimension_numbers = #tpu.dot_dimension_numbers<[1], [0], [0], [1], [0, 0, 1, 1], [], []>} : vector<32x256xbf16>, vector<256x32xbf16>, vector<32x32xf32> -> vector<32x32xf32>
    %114 = arith.addf %93, %113 : vector<32x32xf32>
    %c0_47 = arith.constant 0 : index
    %c0_48 = arith.constant 0 : index
    %115 = vector.load %arg5[%c0_47, %c0_48] : memref<1x32xf32, #tpu.memory_space<vmem>>, vector<1x32xf32>
    %116 = vector.broadcast %115 : vector<1x32xf32> to vector<32x32xf32>
    %117 = arith.addf %114, %116 : vector<32x32xf32>
    %c0_49 = arith.constant 0 : index
    %c0_50 = arith.constant 0 : index
    %118 = vector.load %arg6[%c0_49, %c0_50] : memref<32x32xf32, #tpu.memory_space<vmem>>, vector<32x32xf32>
    tpu.vector_store %arg6[%c0_49, %c0_50], %117 {strides = array<i32>} : memref<32x32xf32, #tpu.memory_space<vmem>>, vector<32x32xf32>,
    return
  }
  func.func @transform_0(%arg0: i32) -> (i32, i32) {
    %c0_i32 = arith.constant 0 : i32
    %c0_i32_0 = arith.constant 0 : i32
    return %arg0, %c0_i32 : i32, i32
  }
  func.func @transform_1(%arg0: i32) -> (i32, i32, i32) {
    %c0_i32 = arith.constant 0 : i32
    %c0_i32_0 = arith.constant 0 : i32
    %c0_i32_1 = arith.constant 0 : i32
    %c0_i32_2 = arith.constant 0 : i32
    return %c0_i32, %c0_i32_0, %c0_i32_1 : i32, i32, i32
  }
  func.func @transform_2(%arg0: i32) -> (i32, i32) {
    %c0_i32 = arith.constant 0 : i32
    %c0_i32_0 = arith.constant 0 : i32
    %c0_i32_1 = arith.constant 0 : i32
    return %c0_i32, %c0_i32_0 : i32, i32
  }
  func.func @transform_3(%arg0: i32) -> (i32, i32, i32) {
    %c0_i32 = arith.constant 0 : i32
    %c0_i32_0 = arith.constant 0 : i32
    %c0_i32_1 = arith.constant 0 : i32
    %c0_i32_2 = arith.constant 0 : i32
    return %c0_i32, %c0_i32_0, %c0_i32_1 : i32, i32, i32
  }
  func.func @transform_4(%arg0: i32) -> (i32, i32) {
    %c0_i32 = arith.constant 0 : i32
    %c0_i32_0 = arith.constant 0 : i32
    %c0_i32_1 = arith.constant 0 : i32
    return %c0_i32, %c0_i32_0 : i32, i32
  }
  func.func @transform_5(%arg0: i32) -> (i32, i32) {
    %c0_i32 = arith.constant 0 : i32
    %c0_i32_0 = arith.constant 0 : i32
    return %arg0, %c0_i32 : i32, i32
  }
}

</mosaic_0001>

<bundles_post_ra>
// kernel: tpu_custom_call.1
= control target key start
LH: loop header
LB: loop body
LE: loop exit
PB: predicated region body
PF: predicated region fallthrough
CT: control target
= control target key end

     0   :  { %v1793_v2 = vmov 0   ;;  %v22_v18 = vlaneseq  ;;  %vm85_vm1 = vcmask 1040384   ;;  %vm1794_vm2 = vmmov 1   ;;  %s2295_s0 = inlined_call_operand.vmem [shape: f32[32,128], index: 0, kind: input, shape index: {}]   ;;  %s2296_s1 = inlined_call_operand.vmem [shape: bf16[3,128,256], index: 1, kind: input, shape index: {}]   ;;  %s2297_s2 = inlined_call_operand.vmem [shape: f32[1,256], index: 2, kind: input, shape index: {}]   ;;  %s2298_s3 = inlined_call_operand.vmem [shape: bf16[3,256,32], index: 3, kind: input, shape index: {}]   ;;  %s2299_s4 = inlined_call_operand.vmem [shape: f32[1,32], index: 4, kind: input, shape index: {}]   ;;  %s2300_s5 = inlined_call_operand.hbm [shape: f32[32,32], index: 5, kind: output, shape index: {}]  }
   0x1   :  { %v1649_v0 = vld [vmem:[%s2296_s1 + $0x84] ss:$8 sps:$4 sm:$0xff]   ;;  %v1651_v1 = vld [vmem:[%s2296_s1 + $0x80] ss:$8 sps:$4 sm:$0xff]   ;;  %274 = vmatprep.mubr.bf16.mxu0 %v1793_v2  ;;  %v1652_v3 = vld [vmem:[%s2296_s1 + $0x94] ss:$8 sps:$4 sm:$0xff]  }
   0x2   :  { %242 = vmatprep.subr.bf16.mxu0 %v1649_v0  ;;  %v1654_v4 = vld [vmem:[%s2296_s1 + $0x90] ss:$8 sps:$4 sm:$0xff]   ;;  %v1655_v5 = vld [vmem:[%s2296_s1 + $0xa4] ss:$8 sps:$4 sm:$0xff]   ;;  %v1657_v6 = vld [vmem:[%s2296_s1 + $0xa0] ss:$8 sps:$4 sm:$0xff]  }
   0x3   :  { %243 = vmatpush1.bf16.msra.mxu0 %v1651_v1  ;;  %v1658_v7 = vld [vmem:[%s2296_s1 + $0xb4] ss:$8 sps:$4 sm:$0xff]   ;;  %v1660_v8 = vld [vmem:[%s2296_s1 + $0xb0] ss:$8 sps:$4 sm:$0xff]   ;;  %v1661_v9 = vld [vmem:[%s2296_s1 + $0xc4] ss:$8 sps:$4 sm:$0xff]  }
   0x4   :  { %244 = vmatprep.subr.bf16.mxu0 %v1652_v3  ;;  %v1663_v10 = vld [vmem:[%s2296_s1 + $0xc0] ss:$8 sps:$4 sm:$0xff]   ;;  %v1664_v11 = vld [vmem:[%s2296_s1 + $0xd4] ss:$8 sps:$4 sm:$0xff]   ;;  %v1666_v12 = vld [vmem:[%s2296_s1 + $0xd0] ss:$8 sps:$4 sm:$0xff]  }
   0x5   :  { %v1667_v13 = vld [vmem:[%s2296_s1 + $0xe4] ss:$8 sps:$4 sm:$0xff]   ;;  %v1669_v14 = vld [vmem:[%s2296_s1 + $0xe0] ss:$8 sps:$4 sm:$0xff]   ;;  %v1670_v15 = vld [vmem:[%s2296_s1 + $0xf4] ss:$8 sps:$4 sm:$0xff]  }
   0x6   :  { %v1672_v16 = vld [vmem:[%s2296_s1 + $0xf0] ss:$8 sps:$4 sm:$0xff]   ;;  %v1880_v17 = vld [vmem:[%s2295_s0] sm:$0xff]  ;;  %v1885_v19 = vld [vmem:[%s2295_s0 + $0x8] sm:$0xff]  ;;  %v1892_v22 = vshrl.u32 %v22_v18, 7 }
   0x7   :  { %245 = vmatpush1.bf16.msra.mxu0 %v1654_v4  ;;  %v1675_v20 = vld [vmem:[%s2296_s1 + $0x4] ss:$8 sps:$4 sm:$0xff]   ;;  %v143_v21 = vpack.c.bf16 %v1885_v19, %v1880_v17  ;;  %v1673_v23 = vld [vmem:[%s2296_s1] ss:$8 sps:$4 sm:$0xff]   ;;  %v1678_v24 = vld [vmem:[%s2296_s1 + $0x14] ss:$8 sps:$4 sm:$0xff]  }
   0x8   :  { %246 = vmatprep.subr.bf16.mxu0 %v1655_v5  ;;  %v25_v25 = vadd.s32 16, %v1892_v22  ;;  %v1676_v26 = vld [vmem:[%s2296_s1 + $0x10] ss:$8 sps:$4 sm:$0xff]   ;;  %v1681_v27 = vld [vmem:[%s2296_s1 + $0x24] ss:$8 sps:$4 sm:$0xff]   ;;  %v31_v29 = vand.u32 15, %v1892_v22 }
   0x9   :  { %v1910_v28 = vld [vmem:[%s2295_s0 + $0x10] sm:$0xff]  ;;  %v1917_v30 = vld [vmem:[%s2295_s0 + $0x18] sm:$0xff]  ;;  %v1721_v31 = vld [vmem:[%s2298_s3 + $0xc0] sm:$0xff]   ;;  %v86_v43 = vrot.slane %v1880_v17, 7  ;;  %v87_v45 = vrot.slane %v1885_v19, 7 }
   0xa   :  { %v45_v32 = vand.u32 15, %v25_v25  ;;  %v1722_v33 = vld [vmem:[%s2298_s3 + $0x80] sm:$0xff]   ;;  %1544 = vmatprep.subr.bf16.mxu1 %v1721_v31  ;;  %v1723_v35 = vld [vmem:[%s2298_s3 + $0xc8] sm:$0xff]   ;;  %v144_v36 = vpack.c.bf16 %v1917_v30, %v1910_v28  ;;  %v97_v37 = vadd.s32 4294967295, %v31_v29  ;;  %v1684_v39 = vld [vmem:[%s2296_s1 + $0x34] ss:$8 sps:$4 sm:$0xff]  }
   0xb   :  { %247 = vmatpush1.bf16.msra.mxu0 %v1657_v6  ;;  %v1679_v34 = vld [vmem:[%s2296_s1 + $0x20] ss:$8 sps:$4 sm:$0xff]   ;;  %1545 = vmatpush3.bf16.msra.mxu1 %v1722_v33  ;;  %v1725_v41 = vld [vmem:[%s2298_s3 + $0xd0] sm:$0xff]   ;;  %v1727_v46 = vld [vmem:[%s2298_s3 + $0xd8] sm:$0xff]   ;;  %v80_v49 = vrot.slane %v1917_v30, 7  ;;  %v89_v52 = vrot.slane %v1910_v28, 7  ;;  %v88_v0 = vsel %vm85_vm1, %v86_v43, %v87_v45 }
   0xc   :  { %248 = vmatprep.subr.bf16.mxu0 %v1658_v7  ;;  %v1724_v38 = vld [vmem:[%s2298_s3 + $0x88] sm:$0xff]   ;;  %1546 = vmatprep.subr.bf16.mxu1 %v1723_v35  ;;  %v1939_v40 = vadd.s32 4294967295, %v45_v32  ;;  %v1682_v42 = vld [vmem:[%s2296_s1 + $0x30] ss:$8 sps:$4 sm:$0xff]   ;;  %vm101_vm0 = vcmp.ge.s32.totalorder %v97_v37, 0  ;;  %v1729_v53 = vld [vmem:[%s2298_s3 + $0xe0] sm:$0xff]  }
   0xd   :  { %v1726_v44 = vld [vmem:[%s2298_s3 + $0x90] sm:$0xff]   ;;  %v1687_v47 = vld [vmem:[%s2296_s1 + $0x44] ss:$8 sps:$4 sm:$0xff]   ;;  %v1685_v48 = vld [vmem:[%s2296_s1 + $0x40] ss:$8 sps:$4 sm:$0xff]   ;;  %v96_v1 = vsel %vm85_vm1, %v80_v49, %v86_v43 }
   0xe   :  { %v1728_v50 = vld [vmem:[%s2298_s3 + $0x98] sm:$0xff]   ;;  %v1730_v54 = vld [vmem:[%s2298_s3 + $0xa0] sm:$0xff]   ;;  %v1731_v56 = vld [vmem:[%s2298_s3 + $0xe8] sm:$0xff]   ;;  %vm103_vm4 = vcmp.ge.s32.totalorder %v1939_v40, 0  ;;  %v1364_v4 = vpack.c.bf16 %v88_v0, %v96_v1 }
   0xf   :  { %249 = vmatpush1.bf16.msra.mxu0 %v1660_v8  ;;  %1547 = vmatpush3.bf16.msra.mxu1 %v1724_v38  ;;  %v1690_v51 = vld [vmem:[%s2296_s1 + $0x54] ss:$8 sps:$4 sm:$0xff]   ;;  %v1688_v55 = vld [vmem:[%s2296_s1 + $0x50] ss:$8 sps:$4 sm:$0xff]   ;;  %v1693_v57 = vld [vmem:[%s2296_s1 + $0x64] ss:$8 sps:$4 sm:$0xff]   ;;  %v90_v8 = vsel %vm85_vm1, %v87_v45, %v89_v52 }
  0x10   :  { %250 = vmatprep.subr.bf16.mxu0 %v1661_v9  ;;  %1548 = vmatprep.subr.bf16.mxu1 %v1725_v41  ;;  %v1732_v58 = vld [vmem:[%s2298_s3 + $0xa8] sm:$0xff]   ;;  %v1696_v60 = vld [vmem:[%s2296_s1 + $0x74] ss:$8 sps:$4 sm:$0xff]   ;;  %vm1996_vm3 = vmpackc.low %vm1794_vm2, %vm101_vm0  ;;  %v91_v9 = vsel %vm85_vm1, %v89_v52, %v80_v49 }
  0x11   :  { %v1691_v59 = vld [vmem:[%s2296_s1 + $0x60] ss:$8 sps:$4 sm:$0xff]   ;;  %v1694_v62 = vld [vmem:[%s2296_s1 + $0x70] ss:$8 sps:$4 sm:$0xff]   ;;  %v1699_v63 = vld [vmem:[%s2296_s1 + $0x104] ss:$8 sps:$4 sm:$0xff]  }
  0x12   :  { %v1697_v3 = vld [vmem:[%s2296_s1 + $0x100] ss:$8 sps:$4 sm:$0xff]   ;;  %v1702_v5 = vld [vmem:[%s2296_s1 + $0x114] ss:$8 sps:$4 sm:$0xff]   ;;  %v1700_v6 = vld [vmem:[%s2296_s1 + $0x110] ss:$8 sps:$4 sm:$0xff]  }
  0x13   :  { %251 = vmatpush1.bf16.msra.mxu0 %v1663_v10  ;;  %1549 = vmatpush3.bf16.msra.mxu1 %v1726_v44  ;;  %v1705_v7 = vld [vmem:[%s2296_s1 + $0x124] ss:$8 sps:$4 sm:$0xff]   ;;  %v1367_v10 = vpack.c.bf16 %v91_v9, %v90_v8 }
  0x14   :  { %252 = vmatprep.subr.bf16.mxu0 %v1664_v11  ;;  %1550 = vmatprep.subr.bf16.mxu1 %v1727_v46 }
  0x17   :  { %253 = vmatpush1.bf16.msra.mxu0 %v1666_v12  ;;  %1551 = vmatpush3.bf16.msra.mxu1 %v1728_v50 }
  0x18   :  { %254 = vmatprep.subr.bf16.mxu0 %v1667_v13  ;;  %1552 = vmatprep.subr.bf16.mxu1 %v1729_v53 }
  0x1b   :  { %255 = vmatpush1.bf16.msra.mxu0 %v1669_v14  ;;  %1553 = vmatpush3.bf16.msra.mxu1 %v1730_v54 }
  0x1c   :  { %256 = vmatprep.subr.bf16.mxu0 %v1670_v15  ;;  %1554 = vmatprep.subr.bf16.mxu1 %v1731_v56 }
  0x1f   :  { %257 = vmatpush1.bf16.msra.mxu0 %v1672_v16  ;;  %1555 = vmatpush3.bf16.msra.mxu1 %v1732_v58 }
  0x20   :  { %375 = vmatprep.subr.bf16.mxu0 %v1675_v20 }
  0x22   :  { %275 = vmatmul.mubr.bf16.vlgmr.msra.gmra.mrb[0].mxu0 %v143_v21 }
  0x23   :  { %376 = vmatpush1.bf16.msra.mxu0 %v1673_v23  ;;  %284 = vmatprep.mubr.bf16.mxu0 %v1793_v2 }
  0x24   :  { %377 = vmatprep.subr.bf16.mxu0 %v1678_v24 }
  0x27   :  { %378 = vmatpush1.bf16.msra.mxu0 %v1676_v26 }
  0x28   :  { %379 = vmatprep.subr.bf16.mxu0 %v1681_v27 }
  0x2a   :  { %285 = vmatmul.mubr.bf16.gmra.mrb[4].mxu0 %v144_v36 }
  0x2b   :  { %380 = vmatpush1.bf16.msra.mxu0 %v1679_v34  ;;  %407 = vmatprep.mubr.bf16.mxu0 %v1793_v2 }
  0x2c   :  { %381 = vmatprep.subr.bf16.mxu0 %v1684_v39 }
  0x2f   :  { %382 = vmatpush1.bf16.msra.mxu0 %v1682_v42 }
  0x30   :  { %383 = vmatprep.subr.bf16.mxu0 %v1687_v47 }
  0x33   :  { %384 = vmatpush1.bf16.msra.mxu0 %v1685_v48 }
  0x34   :  { %385 = vmatprep.subr.bf16.mxu0 %v1690_v51 }
  0x37   :  { %386 = vmatpush1.bf16.msra.mxu0 %v1688_v55 }
  0x38   :  { %387 = vmatprep.subr.bf16.mxu0 %v1693_v57 }
  0x3b   :  { %388 = vmatpush1.bf16.msra.mxu0 %v1691_v59 }
  0x3c   :  { %389 = vmatprep.subr.bf16.mxu0 %v1696_v60 }
  0x3f   :  { %390 = vmatpush1.bf16.msra.mxu0 %v1694_v62 }
  0x40   :  { %569 = vmatprep.subr.bf16.mxu0 %v1699_v63 }
  0x42   :  { %1365 = vmatmul.mubr.msk.bf16.vlgmr.msra.gmra.mrb[0].mxu0 %vm1996_vm3, %v1364_v4 }
  0x43   :  { %570 = vmatpush1.bf16.msra.mxu0 %v1697_v3  ;;  %417 = vmatprep.mubr.bf16.mxu0 %v1793_v2 }
  0x44   :  { %571 = vmatprep.subr.bf16.mxu0 %v1702_v5 }
  0x45   :  { %10 = vsyncpa [#allocation3], 0  ;;  %v1703_v11 = vld [vmem:[%s2296_s1 + $0x120] ss:$8 sps:$4 sm:$0xff]   ;;  %v1708_v13 = vld [vmem:[%s2296_s1 + $0x134] ss:$8 sps:$4 sm:$0xff]  }
  0x46   :  { %vm2032_vm5 = vmpackc.low %vm1794_vm2, %vm103_vm4  ;;  %v1706_v14 = vld [vmem:[%s2296_s1 + $0x130] ss:$8 sps:$4 sm:$0xff]   ;;  %v1711_v15 = vld [vmem:[%s2296_s1 + $0x144] ss:$8 sps:$4 sm:$0xff]   ;;  %v24_v20 = vadd.s32 8, %v1892_v22  ;;  %v429_v25 = vrot.slane %v1880_v17, 1 }
  0x47   :  { %572 = vmatpush1.bf16.msra.mxu0 %v1700_v6  ;;  %v1709_v16 = vld [vmem:[%s2296_s1 + $0x140] ss:$8 sps:$4 sm:$0xff]   ;;  %v1714_v18 = vld [vmem:[%s2296_s1 + $0x154] ss:$8 sps:$4 sm:$0xff]   ;;  %v1712_v21 = vld [vmem:[%s2296_s1 + $0x150] ss:$8 sps:$4 sm:$0xff]  }
  0x48   :  { %573 = vmatprep.subr.bf16.mxu0 %v1705_v7  ;;  %v1717_v23 = vld [vmem:[%s2296_s1 + $0x164] ss:$8 sps:$4 sm:$0xff]   ;;  %v38_v24 = vand.u32 15, %v24_v20  ;;  %v430_v26 = vrot.slane %v1885_v19, 1  ;;  %v432_v27 = vrot.slane %v1910_v28, 1  ;;  %vm428_vm6 = vcmask 1046528  }
  0x49   :  { %v1715_v29 = vld [vmem:[%s2296_s1 + $0x160] ss:$8 sps:$4 sm:$0xff]   ;;  %v1720_v31 = vld [vmem:[%s2296_s1 + $0x174] ss:$8 sps:$4 sm:$0xff]   ;;  %v26_v33 = vadd.s32 24, %v1892_v22  ;;  %v434_v36 = vrot.slane %v1917_v30, 1 }
  0x4a   :  { %1368 = vmatmul.mubr.msk.bf16.gmra.mrb[4].mxu0 %vm2032_vm5, %v1367_v10  ;;  %v443_v32 = vadd.s32 1, %v38_v24  ;;  %v431_v17 = vsel %vm428_vm6, %v429_v25, %v430_v26  ;;  %v433_v19 = vsel %vm428_vm6, %v430_v26, %v432_v27  ;;  %v1718_v28 = vld [vmem:[%s2296_s1 + $0x170] ss:$8 sps:$4 sm:$0xff]   ;;  %v1737_v45 = vld [vmem:[%s2298_s3 + $0x40] sm:$0xff]   ;;  %v634_v46 = vsub.s32 0, %v1892_v22  ;;  %v1763_v12 = vld [vmem:[%s2298_s3 + $0x168] sm:$0xff]  }
  0x4b   :  { %574 = vmatpush1.bf16.msra.mxu0 %v1703_v11  ;;  %601 = vmatprep.mubr.bf16.mxu0 %v1793_v2  ;;  %v52_v34 = vand.u32 15, %v26_v33  ;;  %v1402_v35 = vpack.c.bf16 %v433_v19, %v431_v17  ;;  %v435_v39 = vsel %vm428_vm6, %v432_v27, %v434_v36  ;;  %v441_v40 = vsel %vm428_vm6, %v434_v36, %v429_v25  ;;  %v1733_v42 = vld [vmem:[%s2298_s3 + $0xf0] sm:$0xff]   ;;  %v1735_v43 = vld [vmem:[%s2298_s3 + $0xf8] sm:$0xff]   ;;  %v630_v47 = vld [vmem:[%s2297_s2] sm:$0x3]  ;;  %s1795_s9 = smov [#allocation2]  }
  0x4c   :  { %575 = vmatprep.subr.bf16.mxu0 %v1708_v13  ;;  %vm451_vm7 = vcmp.lt.s32.totalorder %v443_v32, 16  ;;  %v1405_v41 = vpack.c.bf16 %v441_v40, %v435_v39  ;;  %1556 = vmatprep.subr.bf16.mxu1 %v1733_v42  ;;  %v1736_v44 = vld [vmem:[%s2298_s3 + $0xb8] sm:$0xff]   ;;  %v638_v48 = vsub.s32 1, %v1892_v22  ;;  %v635_v49 = vrot.slane %v630_v47, %v634_v46  ;;  %v1738_v11 = vld [vmem:[%s2298_s3] sm:$0xff]   ;;  %v1740_v32 = vld [vmem:[%s2298_s3 + $0x8] sm:$0xff]  }
  0x4d   :  { %vm2078_vm8 = vmpackc.low %vm451_vm7, %vm1794_vm2  ;;  %v445_v38 = vadd.s32 1, %v52_v34  ;;  %v1759_v61 = vld [vmem:[%s2298_s3 + $0x158] sm:$0xff]   ;;  %vm1294_vm11 = vcmask 261120  }
  0x4e   :  { %v639_v50 = vrot.slane %v630_v47, %v638_v48  ;;  %v1743_v47 = vld [vmem:[%s2298_s3 + $0x58] sm:$0xff]  }
  0x4f   :  { %576 = vmatpush1.bf16.msra.mxu0 %v1706_v14  ;;  %vm453_vm9 = vcmp.lt.s32.totalorder %v445_v38, 16 }
  0x50   :  { %577 = vmatprep.subr.bf16.mxu0 %v1711_v15  ;;  %vm2088_vm10 = vmpackc.low %vm453_vm9, %vm1794_vm2 }
  0x53   :  { %578 = vmatpush1.bf16.msra.mxu0 %v1709_v16 }
  0x54   :  { %579 = vmatprep.subr.bf16.mxu0 %v1714_v18  ;;  %v1739_v18 = vld [vmem:[%s2298_s3 + $0x48] sm:$0xff]  }
  0x57   :  { %580 = vmatpush1.bf16.msra.mxu0 %v1712_v21 }
  0x58   :  { %581 = vmatprep.subr.bf16.mxu0 %v1717_v23 }
  0x5b   :  { %582 = vmatpush1.bf16.msra.mxu0 %v1715_v29 }
  0x5c   :  { %583 = vmatprep.subr.bf16.mxu0 %v1720_v31 }
  0x5f   :  { %584 = vmatpush1.bf16.msra.mxu0 %v1718_v28  ;;  %v1741_v28 = vld [vmem:[%s2298_s3 + $0x50] sm:$0xff]  }
  0x62   :  { %1403 = vmatmul.mubr.msk.bf16.vlgmr.msra.gmra.mrb[0].mxu0 %vm2078_vm8, %v1402_v35 }
  0x63   :  { %611 = vmatprep.mubr.bf16.mxu0 %v1793_v2  ;;  %v1734_v2 = vld [vmem:[%s2298_s3 + $0xb0] sm:$0xff]  }
  0x64   :  { %1557 = vmatpush3.bf16.msra.mxu1 %v1734_v2 }
  0x65   :  { %1558 = vmatprep.subr.bf16.mxu1 %v1735_v43 }
  0x68   :  { %1559 = vmatpush3.bf16.msra.mxu1 %v1736_v44 }
  0x69   :  { %1572 = vmatprep.subr.bf16.mxu1 %v1737_v45  ;;  %v1742_v45 = vld [vmem:[%s2298_s3 + $0x10] sm:$0xff]  }
  0x6a   :  { %1406 = vmatmul.mubr.msk.bf16.gmra.mrb[4].mxu0 %vm2088_vm10, %v1405_v41 }
 0x135   :  { %v603_v51 = vpop.f32.mrb[0].mxu0 }
 0x136   :  { %v642_v52 = vadd.f32 %v635_v49, %v603_v51  ;;  %v605_v53 = vpop.f32.mrb[1].mxu0 }
 0x137   :  { %v643_v54 = vadd.f32 %v639_v50, %v605_v53  ;;  %v607_v55 = vpop.f32.mrb[2].mxu0 }
 0x138   :  { %v2114_v56 = vmax.f32 %v642_v52, 0.0  ;;  %v644_v57 = vadd.f32 %v635_v49, %v607_v55  ;;  %v609_v58 = vpop.f32.mrb[3].mxu0 }
 0x139   :  { %v2116_v59 = vmax.f32 %v643_v54, 0.0  ;;  %v645_v60 = vadd.f32 %v639_v50, %v609_v58 }
 0x13a   :  { %v652_v62 = vmax.f32 %v644_v57, 0.0  ;;  %v670_v63 = vrot.slane %v2114_v56, 7  ;;  %v1063_v0 = vrot.slane %v2114_v56, 1 }
 0x13b   :  { %v2120_v22 = vmax.f32 %v645_v60, 0.0  ;;  %v671_v1 = vrot.slane %v2116_v59, 7  ;;  %v1066_v6 = vrot.slane %v2116_v59, 1  ;;  %v1744_v60 = vld [vmem:[%s2298_s3 + $0x18] sm:$0xff]  }
 0x13c   :  { %v672_v3 = vrot.slane %v652_v62, 7  ;;  %v1064_v4 = vrot.slane %v652_v62, 1  ;;  %v736_v5 = vpack.c.bf16 %v652_v62, %v2114_v56  ;;  %v1747_v56 = vld [vmem:[%s2298_s3 + $0x68] sm:$0xff]  }
 0x13d   :  { %v674_v7 = vrot.slane %v2120_v22, 7  ;;  %v1067_v8 = vrot.slane %v2120_v22, 1  ;;  %v613_v9 = vpop.f32.mrb[4].mxu0  ;;  %v737_v10 = vpack.c.bf16 %v2120_v22, %v2116_v59 }
 0x13e   :  { %v2133_v13 = vsel %vm85_vm1, %v670_v63, %v672_v3  ;;  %v2138_v14 = vsel %vm428_vm6, %v1063_v0, %v1064_v4  ;;  %v646_v15 = vadd.f32 %v635_v49, %v613_v9  ;;  %v615_v16 = vpop.f32.mrb[5].mxu0  ;;  %v1751_v9 = vld [vmem:[%s2298_s3 + $0x78] sm:$0xff]  }
 0x13f   :  { %v647_v20 = vadd.f32 %v639_v50, %v615_v16  ;;  %v617_v21 = vpop.f32.mrb[6].mxu0  ;;  %901 = vmatprep.mubr.bf16.mxu1 %v737_v10  ;;  %v675_v23 = vsel %vm85_vm1, %v671_v1, %v674_v7  ;;  %v2145_v24 = vsel %vm428_vm6, %v1066_v6, %v1067_v8  ;;  %v1752_v10 = vld [vmem:[%s2298_s3 + $0x38] sm:$0xff]   ;;  %v1756_v16 = vld [vmem:[%s2298_s3 + $0x108] sm:$0xff]  }
 0x140   :  { %v654_v25 = vmax.f32 %v646_v15, 0.0  ;;  %v648_v26 = vadd.f32 %v635_v49, %v617_v21  ;;  %v619_v27 = vpop.f32.mrb[7].mxu0  ;;  %902 = vmatmul.mubr.bf16.vlgmr.msra.gmra.mrb[0].mxu1 %v736_v5  ;;  %v1755_v15 = vld [vmem:[%s2298_s3 + $0x148] sm:$0xff]   ;;  %v1760_v21 = vld [vmem:[%s2298_s3 + $0x118] sm:$0xff]  }
 0x141   :  { %v655_v29 = vmax.f32 %v647_v20, 0.0  ;;  %v649_v31 = vadd.f32 %v639_v50, %v619_v27  ;;  %1573 = vmatpush3.bf16.msra.mxu1 %v1738_v11  ;;  %v1753_v11 = vld [vmem:[%s2298_s3 + $0x140] sm:$0xff]   ;;  %v1758_v20 = vld [vmem:[%s2298_s3 + $0x110] sm:$0xff]  }
 0x142   :  { %v676_v33 = vrot.slane %v654_v25, 7  ;;  %v1069_v17 = vrot.slane %v654_v25, 1  ;;  %v656_v19 = vmax.f32 %v648_v26, 0.0  ;;  %1574 = vmatprep.subr.bf16.mxu1 %v1739_v18  ;;  %v1757_v18 = vld [vmem:[%s2298_s3 + $0x150] sm:$0xff]  }
 0x143   :  { %v678_v34 = vrot.slane %v655_v29, 7  ;;  %v1071_v35 = vrot.slane %v655_v29, 1  ;;  %v657_v36 = vmax.f32 %v649_v31, 0.0  ;;  %v1765_v26 = vld [vmem:[%s2298_s3 + $0x170] sm:$0xff]   ;;  %v1768_v31 = vld [vmem:[%s2298_s3 + $0x138] sm:$0xff]  }
 0x144   :  { %v2154_v38 = vsel %vm428_vm6, %v1064_v4, %v1069_v17  ;;  %v660_v39 = vrot.slane %v656_v19, 7  ;;  %v1073_v40 = vrot.slane %v656_v19, 1  ;;  %v738_v41 = vpack.c.bf16 %v656_v19, %v654_v25  ;;  %v1764_v25 = vld [vmem:[%s2298_s3 + $0x128] sm:$0xff]   ;;  %v1766_v27 = vld [vmem:[%s2298_s3 + $0x130] sm:$0xff]  }
 0x145   :  { %v1535_v42 = vpack.c.bf16 %v2154_v38, %v2138_v14  ;;  %v661_v2 = vrot.slane %v657_v36, 7  ;;  %v1075_v43 = vrot.slane %v657_v36, 1  ;;  %1575 = vmatpush3.bf16.msra.mxu1 %v1740_v32  ;;  %v739_v44 = vpack.c.bf16 %v657_v36, %v655_v29  ;;  %v1767_v29 = vld [vmem:[%s2298_s3 + $0x178] sm:$0xff]  }
 0x146   :  { %v690_v46 = vsel %vm85_vm1, %v660_v39, %v670_v63  ;;  %1576 = vmatprep.subr.bf16.mxu1 %v1741_v28  ;;  %v679_v48 = vsel %vm85_vm1, %v674_v7, %v678_v34  ;;  %v677_v49 = vsel %vm85_vm1, %v672_v3, %v676_v33  ;;  %v680_v50 = vsel %vm85_vm1, %v676_v33, %v660_v39  ;;  %v1745_v3 = vld [vmem:[%s2298_s3 + $0x60] sm:$0xff]   ;;  %v1749_v7 = vld [vmem:[%s2298_s3 + $0x70] sm:$0xff]  }
 0x147   :  { %v1475_v51 = vpack.c.bf16 %v2133_v13, %v690_v46  ;;  %909 = vmatprep.mubr.bf16.mxu1 %v739_v44  ;;  %v691_v52 = vsel %vm85_vm1, %v661_v2, %v671_v1  ;;  %v681_v53 = vsel %vm85_vm1, %v678_v34, %v661_v2  ;;  %v1481_v54 = vpack.c.bf16 %v680_v50, %v677_v49  ;;  %v1754_v13 = vld [vmem:[%s2298_s3 + $0x100] sm:$0xff]  }
 0x148   :  { %910 = vmatmul.mubr.bf16.gmra.mrb[4].mxu1 %v738_v41  ;;  %v1472_v55 = vpack.c.bf16 %v675_v23, %v691_v52  ;;  %v1478_v57 = vpack.c.bf16 %v681_v53, %v679_v48  ;;  %v1072_v58 = vsel %vm428_vm6, %v1067_v8, %v1071_v35  ;;  %v2173_v59 = vsel %vm428_vm6, %v1071_v35, %v1075_v43  ;;  %v1750_v8 = vld [vmem:[%s2298_s3 + $0x30] sm:$0xff]   ;;  %v1761_v23 = vld [vmem:[%s2298_s3 + $0x160] sm:$0xff]  }
 0x149   :  { %1577 = vmatpush3.bf16.msra.mxu1 %v1742_v45  ;;  %v1532_v62 = vpack.c.bf16 %v1072_v58, %v2145_v24  ;;  %v1088_v63 = vsel %vm428_vm6, %v1075_v43, %v1066_v6  ;;  %v1074_v22 = vsel %vm428_vm6, %v1069_v17, %v1073_v40  ;;  %v1087_v1 = vsel %vm428_vm6, %v1073_v40, %v1063_v0  ;;  %v1746_v6 = vld [vmem:[%s2298_s3 + $0x20] sm:$0xff]   ;;  %v1748_v0 = vld [vmem:[%s2298_s3 + $0x28] sm:$0xff]  }
 0x14a   :  { %1473 = vmatprep.mubr.msk.bf16.mxu1 %vm1996_vm3, %v1472_v55  ;;  %1578 = vmatprep.subr.bf16.mxu1 %v1743_v47  ;;  %v1538_v4 = vpack.c.bf16 %v1088_v63, %v2173_v59  ;;  %v1541_v5 = vpack.c.bf16 %v1087_v1, %v1074_v22  ;;  %v1762_v24 = vld [vmem:[%s2298_s3 + $0x120] sm:$0xff]  }
 0x14b   :  { %v1543_v59 = vld [vmem:[%s2299_s4] ss:$0 sm:$0xff]  ;;  %s1304_s4 = sshll.u32 %s1795_s9, 4  ;;  %s1305_s4 = int_to_ptr.vmem [resolvable:$true] %s1304_s4 }
 0x14c   :  { %s1769_s10 = scalar_lea.vmem %s1305_s4, 512  ;;  %p1774_p1 = scmp.lt.s32.totalorder %s1305_s4, %s1305_s4 }
 0x14d   :  { %1579 = vmatpush3.bf16.msra.mxu1 %v1744_v60  ;;  %p1770_p0 = scmp.ne.s32.totalorder %s1305_s4, %s1769_s10  ;;  %p1775_p2 = scmp.lt.s32.totalorder %s1769_s10, %s1769_s10 }
 0x14e   :  { %1580 = vmatprep.subr.bf16.mxu1 %v1745_v3 }
 0x14f   :  { %p1776_p3 = por %p1775_p2, %p1774_p1 }
 0x151   :  { %1581 = vmatpush3.bf16.msra.mxu1 %v1746_v6  ;;  %p1777_p4 = pnand %p1776_p3, %p1770_p0 }
 0x152   :  { %1582 = vmatprep.subr.bf16.mxu1 %v1747_v56 }
 0x155   :  { %1583 = vmatpush3.bf16.msra.mxu1 %v1748_v0 }
 0x156   :  { %1584 = vmatprep.subr.bf16.mxu1 %v1749_v7 }
 0x159   :  { %1585 = vmatpush3.bf16.msra.mxu1 %v1750_v8 }
 0x15a   :  { %1586 = vmatprep.subr.bf16.mxu1 %v1751_v9 }
 0x15d   :  { %1587 = vmatpush3.bf16.msra.mxu1 %v1752_v10 }
 0x15e   :  { %1600 = vmatprep.subr.bf16.mxu1 %v1753_v11 }
 0x160   :  { %1476 = vmatmul.mubr.msk.bf16.vlgmr.msra.gmra.mrb[8].mxu1 %vm1996_vm3, %v1475_v51 }
 0x161   :  { %1479 = vmatprep.mubr.msk.bf16.mxu1 %vm2032_vm5, %v1478_v57  ;;  %1601 = vmatpush3.bf16.msra.mxu1 %v1754_v13 }
 0x162   :  { %1602 = vmatprep.subr.bf16.mxu1 %v1755_v15 }
 0x165   :  { %1603 = vmatpush3.bf16.msra.mxu1 %v1756_v16 }
 0x166   :  { %1604 = vmatprep.subr.bf16.mxu1 %v1757_v18 }
 0x168   :  { %1482 = vmatmul.mubr.msk.bf16.gmra.mrb[12].mxu1 %vm2032_vm5, %v1481_v54 }
 0x169   :  { %1605 = vmatpush3.bf16.msra.mxu1 %v1758_v20  ;;  %1533 = vmatprep.mubr.msk.bf16.mxu1 %vm2078_vm8, %v1532_v62 }
 0x16a   :  { %1606 = vmatprep.subr.bf16.mxu1 %v1759_v61 }
 0x16d   :  { %1607 = vmatpush3.bf16.msra.mxu1 %v1760_v21 }
 0x16e   :  { %1608 = vmatprep.subr.bf16.mxu1 %v1761_v23 }
 0x171   :  { %1609 = vmatpush3.bf16.msra.mxu1 %v1762_v24 }
 0x172   :  { %1610 = vmatprep.subr.bf16.mxu1 %v1763_v12 }
 0x175   :  { %1611 = vmatpush3.bf16.msra.mxu1 %v1764_v25 }
 0x176   :  { %1612 = vmatprep.subr.bf16.mxu1 %v1765_v26 }
 0x179   :  { %1613 = vmatpush3.bf16.msra.mxu1 %v1766_v27 }
 0x17a   :  { %1614 = vmatprep.subr.bf16.mxu1 %v1767_v29 }
 0x17d   :  { %1615 = vmatpush3.bf16.msra.mxu1 %v1768_v31 }
 0x180   :  { %1536 = vmatmul.mubr.msk.bf16.vlgmr.msra.gmra.mrb[16].mxu1 %vm2078_vm8, %v1535_v42 }
 0x181   :  { %1539 = vmatprep.mubr.msk.bf16.mxu1 %vm2088_vm10, %v1538_v4 }
 0x188   :  { %1542 = vmatmul.mubr.msk.bf16.gmra.mrb[20].mxu1 %vm2088_vm10, %v1541_v5 }
 0x213   :  { %v1560_v32 = vpop.f32.mrb[0].mxu1 }
 0x214   :  { %v1561_v33 = vpop.f32.mrb[1].mxu1 }
 0x215   :  { %v1562_v17 = vadd.f32 %v1561_v33, %v1560_v32  ;;  %v1563_v19 = vpop.f32.mrb[2].mxu1 }
 0x216   :  { %v1564_v28 = vpop.f32.mrb[3].mxu1 }
 0x217   :  { %v1565_v34 = vadd.f32 %v1564_v28, %v1563_v19 }
 0x21b   :  { %v1566_v35 = vpop.f32.mrb[4].mxu1 }
 0x21c   :  { %v1567_v36 = vpop.f32.mrb[5].mxu1 }
 0x21d   :  { %v1568_v39 = vadd.f32 %v1567_v36, %v1566_v35  ;;  %v1569_v40 = vpop.f32.mrb[6].mxu1 }
 0x21e   :  { %v1570_v14 = vpop.f32.mrb[7].mxu1 }
 0x21f   :  { %v1571_v38 = vadd.f32 %v1570_v14, %v1569_v40 }
 0x233   :  { %v1588_v37 = vpop.f32.mrb[8].mxu1 }
 0x234   :  { %v1589_v41 = vpop.f32.mrb[9].mxu1 }
 0x235   :  { %v1590_v42 = vadd.f32 %v1589_v41, %v1588_v37  ;;  %v1591_v2 = vpop.f32.mrb[10].mxu1 }
 0x236   :  { %v1592_v43 = vpop.f32.mrb[11].mxu1 }
 0x237   :  { %v1049_v44 = vadd.f32 %v1590_v42, %v1562_v17  ;;  %v1593_v30 = vadd.f32 %v1592_v43, %v1591_v2 }
 0x239   :  { %v1052_v45 = vadd.f32 %v1593_v30, %v1565_v34 }
 0x23b   :  { %v1594_v46 = vpop.f32.mrb[12].mxu1 }
 0x23c   :  { %v1595_v47 = vpop.f32.mrb[13].mxu1 }
 0x23d   :  { %v1596_v48 = vadd.f32 %v1595_v47, %v1594_v46  ;;  %v1597_v49 = vpop.f32.mrb[14].mxu1 }
 0x23e   :  { %v1598_v50 = vpop.f32.mrb[15].mxu1 }
 0x23f   :  { %v1057_v51 = vadd.f32 %v1596_v48, %v1568_v39  ;;  %v1599_v52 = vadd.f32 %v1598_v50, %v1597_v49 }
 0x241   :  { %v1060_v53 = vadd.f32 %v1599_v52, %v1571_v38 }
 0x253   :  { %v1616_v54 = vpop.f32.mrb[16].mxu1 }
 0x254   :  { %v1617_v55 = vpop.f32.mrb[17].mxu1 }
 0x255   :  { %v1618_v57 = vadd.f32 %v1617_v55, %v1616_v54  ;;  %v1619_v58 = vpop.f32.mrb[18].mxu1 }
 0x256   :  { %v1620_v60 = vpop.f32.mrb[19].mxu1 }
 0x257   :  { %v1279_v62 = vadd.f32 %v1618_v57, %v1049_v44  ;;  %v1621_v63 = vadd.f32 %v1620_v60, %v1619_v58 }
 0x259   :  { %v1290_v22 = vadd.f32 %v1543_v59, %v1279_v62  ;;  %v1280_v1 = vadd.f32 %v1621_v63, %v1052_v45 }
 0x25b   :  { %1295 = vst.msk [vmem:[#allocation2] sm:$0xff] %vm1294_vm11, %v1290_v22  ;;  %v1291_v3 = vadd.f32 %v1543_v59, %v1280_v1  ;;  %v1622_v4 = vpop.f32.mrb[20].mxu1 }
 0x25c   :  { %v1623_v5 = vpop.f32.mrb[21].mxu1 }
 0x25d   :  { %1296 = vst.msk [vmem:[#allocation2 + $0x8] sm:$0xff] %vm1294_vm11, %v1291_v3  ;;  %v1624_v6 = vadd.f32 %v1623_v5, %v1622_v4  ;;  %v1625_v56 = vpop.f32.mrb[22].mxu1 }
 0x25e   :  { %v1626_v0 = vpop.f32.mrb[23].mxu1 }
 0x25f   :  { %v1281_v7 = vadd.f32 %v1624_v6, %v1057_v51  ;;  %v1627_v8 = vadd.f32 %v1626_v0, %v1625_v56 }
 0x261   :  { %v1292_v9 = vadd.f32 %v1543_v59, %v1281_v7  ;;  %v1282_v10 = vadd.f32 %v1627_v8, %v1060_v53 }
 0x263   :  { %1297 = vst.msk [vmem:[#allocation2 + $0x10] sm:$0xff] %vm1294_vm11, %v1292_v9  ;;  %v1293_v11 = vadd.f32 %v1543_v59, %v1282_v10 }
 0x265   :  { %1298 = vst.msk [vmem:[#allocation2 + $0x18] sm:$0xff] %vm1294_vm11, %v1293_v11 }
 0x266   :  { %1780 = shalt.err (!%p1777_p4)
}
 0x267   :  { %s1781_s13 = scalar_lea.hbm %s2300_s5, 512 }
 0x268   :  { %p1782_p5 = scmp.ne.s32.totalorder %s2300_s5, %s1781_s13  ;;  %p1785_p6 = scmp.lt.u32.totalorder %s1781_s13, %s2300_s5 }
 0x26a   :  { %p1787_p7 = pnand %p1785_p6, %p1782_p5 }
 0x26c   :  { %1790 = shalt.err (!%p1787_p7)
}
 0x26d   :  { %s1796_s1 = smov 128   ;;  %s1797_s18 = smov 8  }
 0x26e   :  { %1310 = dma.vmem_to_hbm [thread:$0]  %s1305_s4, 512, %s2300_s5, [#allocation3], %s1796_s1, %s1796_s1, %s1797_s18  }
 0x26f   :  { %1791 = dma.done.wait [#allocation3], 512  }
 0x270   :  { %1792 = vsyncadd [#allocation3], 4294966784 }
 0x271   :  { %1314 = vsyncpa [#allocation3], 1 }

</bundles_post_ra>
